<compile_context>
chip_gen: v6e
topology: v6e:2x2x1
jax: 0.10.0
libtpu: 0.0.40
codegen_flags: <defaults>
</compile_context>

<pallas_src>
import jax
import jax.numpy as jnp
from jax import lax
from jax.experimental import pallas as pl
from jax.experimental.pallas import tpu as pltpu


def lstm_recurrence_kernel(xproj_ref, whh_ref, hs_ref, h_sc, c_sc):
    """LSTM recurrence over one T-chunk; h/c carried across grid steps.

    xproj_ref : (Tc, Bp, 4H) pre-projected gate inputs (x@W_ih.T + b_ih + b_hh)
    whh_ref   : (H, 4H)      hidden->hidden weights, pre-transposed, lane-dense
    hs_ref    : (Tc, Bp, H)  output hidden states for this chunk
    h_sc,c_sc : (Bp, H)      recurrent state in VMEM scratch (persists across grid)
    """
    H = h_sc.shape[1]
    Tc = hs_ref.shape[0]

    @pl.when(pl.program_id(0) == 0)
    def _init():
        h_sc[...] = jnp.zeros_like(h_sc)
        c_sc[...] = jnp.zeros_like(c_sc)

    # Small weight slab (H x 4H) -> hoist once per chunk.
    w = whh_ref[...]                                     # (H, 4H)

    def step(t, carry):
        h = h_sc[...]
        # One fused MXU push per timestep; result is lane-dense (Bp, 128).
        gates = xproj_ref[t] + jnp.dot(h, w, preferred_element_type=jnp.float32)

        i_g = jax.nn.sigmoid(gates[:, 0 * H:1 * H])
        f_g = jax.nn.sigmoid(gates[:, 1 * H:2 * H])
        g_g = jnp.tanh(gates[:, 2 * H:3 * H])
        o_g = jax.nn.sigmoid(gates[:, 3 * H:4 * H])

        c_new = f_g * c_sc[...] + i_g * g_g
        h_new = o_g * jnp.tanh(c_new)

        c_sc[...] = c_new
        h_sc[...] = h_new
        hs_ref[t] = h_new                                # VMEM store; chunk writes back once
        return carry

    # Short, static trip count per chunk -> unroll for LLO scheduler visibility.
    lax.fori_loop(0, Tc, step, 0, unroll=True)


def toxic_lstm_forward(sequence, emb_table, w_ih, w_hh, b_ih, b_hh, w_reg, b_reg,
                       t_chunk=None):
    """sequence: (T, B) int32; returns (T, B, 1) float32."""
    T, B = sequence.shape
    V, E = emb_table.shape
    H = w_hh.shape[1]            # w_hh: (4H, H), gate order i,f,g,o

    # ---- glue in XLA (outside the recurrent kernel) -------------------------
    # Embedding lookup.
    x = emb_table[sequence].astype(jnp.float32)                      # (T, B, E)

    # Hoisted input projection: one well-shaped matmul + bias fold.
    b = (b_ih + b_hh).astype(jnp.float32)                            # (4H,)
    x_proj = (x.reshape(T * B, E) @ w_ih.T.astype(jnp.float32)
              + b).reshape(T, B, 4 * H)                              # (T, B, 4H)

    # Pad batch to a sublane multiple (>= 8); padded rows are discarded later.
    Bp = max(8, ((B + 7) // 8) * 8)
    if Bp != B:
        x_proj = jnp.pad(x_proj, ((0, 0), (0, Bp - B), (0, 0)))

    # Single lane-dense weight slab (H, 4H); gates sliced inside the kernel.
    w_hh_t = w_hh.T.astype(jnp.float32)                              # (H, 4H)

    # ---- pick a T-chunk (double-buffered streaming; sized for 64 MiB v7x) ---
    if t_chunk is None:
        t_chunk = T
        for cand in (64, 32, 16, 8, 4, 2, 1):
            if cand <= T and T % cand == 0:
                t_chunk = cand
                break
    assert T % t_chunk == 0, (T, t_chunk)
    Tc = t_chunk

    footprint = 4 * (2 * Tc * Bp * 4 * H      # x_proj chunk, double-buffered
                     + 2 * H * 4 * H          # whh, double-buffered
                     + 2 * Tc * Bp * H        # hs chunk, double-buffered
                     + 2 * Bp * H)            # h/c scratch
    vmem_limit = int(min(max(2 * footprint, 1 << 20), 48 << 20))

    # ---- recurrent Pallas kernel: T-chunked grid, state carried in scratch --
    hs = pl.pallas_call(
        lstm_recurrence_kernel,
        out_shape=jax.ShapeDtypeStruct((T, Bp, H), jnp.float32),
        grid_spec=pltpu.PrefetchScalarGridSpec(
            num_scalar_prefetch=0,
            grid=(T // Tc,),
            in_specs=[
                pl.BlockSpec((Tc, Bp, 4 * H), lambda t: (t, 0, 0)),  # x_proj chunk
                pl.BlockSpec((H, 4 * H), lambda t: (0, 0)),          # W_hh^T (resident)
            ],
            out_specs=pl.BlockSpec((Tc, Bp, H), lambda t: (t, 0, 0)),
            scratch_shapes=[
                pltpu.VMEM((Bp, H), jnp.float32),   # h state (carried across chunks)
                pltpu.VMEM((Bp, H), jnp.float32),   # c state
            ],
        ),
        compiler_params=pltpu.CompilerParams(
            dimension_semantics=("arbitrary",),      # time must stay serial
            vmem_limit_bytes=vmem_limit,
        ),
    )(x_proj, w_hh_t)                                                # (T, Bp, H)

    hs = hs[:, :B, :]                                                # drop batch padding

    # ---- regressor head as one lane-dense XLA matmul -------------------------
    return hs @ w_reg.T.astype(jnp.float32) + b_reg.astype(jnp.float32)  # (T, B, 1)


def reference_forward(sequence, emb_table, w_ih, w_hh, b_ih, b_hh, w_reg, b_reg):
    """Pure-JAX reference (mirrors torch.nn.LSTM + Linear)."""
    T, B = sequence.shape
    H = w_hh.shape[1]
    x = emb_table[sequence]                                  # (T, B, E)

    def step(carry, x_t):
        h, c = carry
        gates = x_t @ w_ih.T + h @ w_hh.T + b_ih + b_hh      # (B, 4H)
        i = jax.nn.sigmoid(gates[:, 0 * H:1 * H])
        f = jax.nn.sigmoid(gates[:, 1 * H:2 * H])
        g = jnp.tanh(gates[:, 2 * H:3 * H])
        o = jax.nn.sigmoid(gates[:, 3 * H:4 * H])
        c = f * c + i * g
        h = o * jnp.tanh(c)
        return (h, c), h

    h0 = jnp.zeros((B, H), jnp.float32)
    c0 = jnp.zeros((B, H), jnp.float32)
    _, hs = lax.scan(step, (h0, c0), x)                      # (T, B, H)
    return hs @ w_reg.T + b_reg                              # (T, B, 1)


if __name__ == "__main__":
    # Small shapes consistent with the module: vocab == embed_dim (square table).
    T, B = 8, 4          # seq_len, batch
    V = E = 16           # vocab size == embedding dim (required by the module as written)
    H = 32               # hidden_dim  (4H = 128 lanes: one MXU push per step)

    key = jax.random.PRNGKey(0)
    k_emb, k_wih, k_whh, k_bih, k_bhh, k_wr, k_br, k_seq = jax.random.split(key, 8)

    emb_table = jax.random.normal(k_emb, (V, E), jnp.float32) * 0.5
    w_ih = jax.random.normal(k_wih, (4 * H, E), jnp.float32) * 0.1   # nn.LSTM weight_ih_l0
    w_hh = jax.random.normal(k_whh, (4 * H, H), jnp.float32) * 0.1   # nn.LSTM weight_hh_l0
    b_ih = jax.random.normal(k_bih, (4 * H,), jnp.float32) * 0.1
    b_hh = jax.random.normal(k_bhh, (4 * H,), jnp.float32) * 0.1
    w_reg = jax.random.normal(k_wr, (1, H), jnp.float32) * 0.1       # nn.Linear weight
    b_reg = jax.random.normal(k_br, (1,), jnp.float32) * 0.1         # nn.Linear bias

    sequence = jax.random.randint(k_seq, (T, B), 0, V, jnp.int32)

    # t_chunk=4 -> 2 grid steps, so the h/c carry across chunks is exercised.
    out = toxic_lstm_forward(sequence, emb_table, w_ih, w_hh, b_ih, b_hh,
                             w_reg, b_reg, t_chunk=4)
    out = jax.block_until_ready(out)

    ref = reference_forward(sequence, emb_table, w_ih, w_hh, b_ih, b_hh, w_reg, b_reg)
    assert out.shape == (T, B, 1), out.shape
    assert jnp.allclose(out, ref, atol=1e-5, rtol=1e-5), float(jnp.max(jnp.abs(out - ref)))

    print("KERNEL_OK")
</pallas_src>

<mosaic_0001>
module attributes {stable_mosaic.version = 11 : i64} {
  func.func @lstm_recurrence_kernel(%arg0: i32, %arg1: memref<4x8x128xf32, #tpu.memory_space<vmem>>, %arg2: memref<32x128xf32, #tpu.memory_space<vmem>>, %arg3: memref<4x8x32xf32, #tpu.memory_space<vmem>>, %arg4: memref<8x32xf32, #tpu.memory_space<vmem>>, %arg5: memref<8x32xf32, #tpu.memory_space<vmem>>) attributes {dimension_semantics = [#tpu.dimension_semantics<arbitrary>], iteration_bounds = array<i64: 2>, scalar_prefetch = 0 : i64, scratch_operands = 2 : i64, tpu.core_type = #tpu.core_type<tc>, window_params = [{transform_indices = @transform_0, window_bounds = array<i64: 4, 8, 128>}, {pipeline_mode = #tpu.pipeline_mode<synchronous>, transform_indices = @transform_1, window_bounds = array<i64: 32, 128>}, {transform_indices = @transform_2, window_bounds = array<i64: 4, 8, 32>}]} {
    %c0_i32 = arith.constant 0 : i32
    %0 = arith.cmpi eq, %arg0, %c0_i32 : i32
    %1 = arith.extui %0 : i1 to i32
    %c0_i32_0 = arith.constant 0 : i32
    %2 = arith.cmpi ne, %1, %c0_i32_0 : i32
    scf.if %2 {
      %cst_66 = arith.constant 0.000000e+00 : f32
      %156 = vector.broadcast %cst_66 : f32 to vector<8x32xf32>
      %c0_67 = arith.constant 0 : index
      %c0_68 = arith.constant 0 : index
      %157 = vector.load %arg4[%c0_67, %c0_68] : memref<8x32xf32, #tpu.memory_space<vmem>>, vector<8x32xf32>
      tpu.vector_store %arg4[%c0_67, %c0_68], %156 {strides = array<i32>} : memref<8x32xf32, #tpu.memory_space<vmem>>, vector<8x32xf32>,
      %cst_69 = arith.constant 0.000000e+00 : f32
      %158 = vector.broadcast %cst_69 : f32 to vector<8x32xf32>
      %c0_70 = arith.constant 0 : index
      %c0_71 = arith.constant 0 : index
      %159 = vector.load %arg5[%c0_70, %c0_71] : memref<8x32xf32, #tpu.memory_space<vmem>>, vector<8x32xf32>
      tpu.vector_store %arg5[%c0_70, %c0_71], %158 {strides = array<i32>} : memref<8x32xf32, #tpu.memory_space<vmem>>, vector<8x32xf32>,
    } else {
    }
    %c0 = arith.constant 0 : index
    %c0_1 = arith.constant 0 : index
    %3 = vector.load %arg2[%c0, %c0_1] : memref<32x128xf32, #tpu.memory_space<vmem>>, vector<32x128xf32>
    %c0_i32_2 = arith.constant 0 : i32
    %c0_3 = arith.constant 0 : index
    %c0_4 = arith.constant 0 : index
    %4 = vector.load %arg4[%c0_3, %c0_4] : memref<8x32xf32, #tpu.memory_space<vmem>>, vector<8x32xf32>
    %5 = arith.index_cast %c0_i32_2 : i32 to index
    %c0_5 = arith.constant 0 : index
    %c0_6 = arith.constant 0 : index
    %6 = vector.load %arg1[%5, %c0_5, %c0_6] : memref<4x8x128xf32, #tpu.memory_space<vmem>>, vector<1x8x128xf32>
    %7 = vector.shape_cast %6 : vector<1x8x128xf32> to vector<8x128xf32>
    %cst = arith.constant dense<0.000000e+00> : vector<8x128xf32>
    %8 = tpu.matmul %4, %3, %cst {dimension_numbers = #tpu.dot_dimension_numbers<[1], [0], [0], [1], [0, 0, 1, 1], [], []>} : vector<8x32xf32>, vector<32x128xf32>, vector<8x128xf32> -> vector<8x128xf32>
    %9 = arith.addf %7, %8 : vector<8x128xf32>
    %10 = vector.extract_strided_slice %9 {offsets = [0, 0], sizes = [8, 32], strides = [1, 1]} : vector<8x128xf32> to vector<8x32xf32>
    %11 = arith.negf %10 : vector<8x32xf32>
    %12 = math.exp %11 : vector<8x32xf32>
    %cst_7 = arith.constant 1.000000e+00 : f32
    %13 = vector.broadcast %cst_7 : f32 to vector<8x32xf32>
    %14 = arith.addf %13, %12 : vector<8x32xf32>
    %15 = arith.divf %13, %14 : vector<8x32xf32>
    %16 = vector.extract_strided_slice %9 {offsets = [0, 32], sizes = [8, 32], strides = [1, 1]} : vector<8x128xf32> to vector<8x32xf32>
    %17 = arith.negf %16 : vector<8x32xf32>
    %18 = math.exp %17 : vector<8x32xf32>
    %cst_8 = arith.constant 1.000000e+00 : f32
    %19 = vector.broadcast %cst_8 : f32 to vector<8x32xf32>
    %20 = arith.addf %19, %18 : vector<8x32xf32>
    %21 = arith.divf %19, %20 : vector<8x32xf32>
    %22 = vector.extract_strided_slice %9 {offsets = [0, 64], sizes = [8, 32], strides = [1, 1]} : vector<8x128xf32> to vector<8x32xf32>
    %23 = math.tanh %22 : vector<8x32xf32>
    %24 = vector.extract_strided_slice %9 {offsets = [0, 96], sizes = [8, 32], strides = [1, 1]} : vector<8x128xf32> to vector<8x32xf32>
    %25 = arith.negf %24 : vector<8x32xf32>
    %26 = math.exp %25 : vector<8x32xf32>
    %cst_9 = arith.constant 1.000000e+00 : f32
    %27 = vector.broadcast %cst_9 : f32 to vector<8x32xf32>
    %28 = arith.addf %27, %26 : vector<8x32xf32>
    %29 = arith.divf %27, %28 : vector<8x32xf32>
    %c0_10 = arith.constant 0 : index
    %c0_11 = arith.constant 0 : index
    %30 = vector.load %arg5[%c0_10, %c0_11] : memref<8x32xf32, #tpu.memory_space<vmem>>, vector<8x32xf32>
    %31 = arith.mulf %21, %30 : vector<8x32xf32>
    %32 = arith.mulf %15, %23 : vector<8x32xf32>
    %33 = arith.addf %31, %32 : vector<8x32xf32>
    %34 = math.tanh %33 : vector<8x32xf32>
    %35 = arith.mulf %29, %34 : vector<8x32xf32>
    %c0_12 = arith.constant 0 : index
    %c0_13 = arith.constant 0 : index
    %36 = vector.load %arg5[%c0_12, %c0_13] : memref<8x32xf32, #tpu.memory_space<vmem>>, vector<8x32xf32>
    tpu.vector_store %arg5[%c0_12, %c0_13], %33 {strides = array<i32>} : memref<8x32xf32, #tpu.memory_space<vmem>>, vector<8x32xf32>,
    %c0_14 = arith.constant 0 : index
    %c0_15 = arith.constant 0 : index
    %37 = vector.load %arg4[%c0_14, %c0_15] : memref<8x32xf32, #tpu.memory_space<vmem>>, vector<8x32xf32>
    tpu.vector_store %arg4[%c0_14, %c0_15], %35 {strides = array<i32>} : memref<8x32xf32, #tpu.memory_space<vmem>>, vector<8x32xf32>,
    %38 = arith.index_cast %c0_i32_2 : i32 to index
    %c0_16 = arith.constant 0 : index
    %c0_17 = arith.constant 0 : index
    %39 = vector.load %arg3[%38, %c0_16, %c0_17] : memref<4x8x32xf32, #tpu.memory_space<vmem>>, vector<1x8x32xf32>
    %40 = vector.shape_cast %39 : vector<1x8x32xf32> to vector<8x32xf32>
    %41 = vector.shape_cast %35 : vector<8x32xf32> to vector<1x8x32xf32>
    tpu.vector_store %arg3[%38, %c0_16, %c0_17], %41 {strides = array<i32>} : memref<4x8x32xf32, #tpu.memory_space<vmem>>, vector<1x8x32xf32>,
    %c1_i32 = arith.constant 1 : i32
    %c0_18 = arith.constant 0 : index
    %c0_19 = arith.constant 0 : index
    %42 = vector.load %arg4[%c0_18, %c0_19] : memref<8x32xf32, #tpu.memory_space<vmem>>, vector<8x32xf32>
    %43 = arith.index_cast %c1_i32 : i32 to index
    %c0_20 = arith.constant 0 : index
    %c0_21 = arith.constant 0 : index
    %44 = vector.load %arg1[%43, %c0_20, %c0_21] : memref<4x8x128xf32, #tpu.memory_space<vmem>>, vector<1x8x128xf32>
    %45 = vector.shape_cast %44 : vector<1x8x128xf32> to vector<8x128xf32>
    %cst_22 = arith.constant dense<0.000000e+00> : vector<8x128xf32>
    %46 = tpu.matmul %42, %3, %cst_22 {dimension_numbers = #tpu.dot_dimension_numbers<[1], [0], [0], [1], [0, 0, 1, 1], [], []>} : vector<8x32xf32>, vector<32x128xf32>, vector<8x128xf32> -> vector<8x128xf32>
    %47 = arith.addf %45, %46 : vector<8x128xf32>
    %48 = vector.extract_strided_slice %47 {offsets = [0, 0], sizes = [8, 32], strides = [1, 1]} : vector<8x128xf32> to vector<8x32xf32>
    %49 = arith.negf %48 : vector<8x32xf32>
    %50 = math.exp %49 : vector<8x32xf32>
    %cst_23 = arith.constant 1.000000e+00 : f32
    %51 = vector.broadcast %cst_23 : f32 to vector<8x32xf32>
    %52 = arith.addf %51, %50 : vector<8x32xf32>
    %53 = arith.divf %51, %52 : vector<8x32xf32>
    %54 = vector.extract_strided_slice %47 {offsets = [0, 32], sizes = [8, 32], strides = [1, 1]} : vector<8x128xf32> to vector<8x32xf32>
    %55 = arith.negf %54 : vector<8x32xf32>
    %56 = math.exp %55 : vector<8x32xf32>
    %cst_24 = arith.constant 1.000000e+00 : f32
    %57 = vector.broadcast %cst_24 : f32 to vector<8x32xf32>
    %58 = arith.addf %57, %56 : vector<8x32xf32>
    %59 = arith.divf %57, %58 : vector<8x32xf32>
    %60 = vector.extract_strided_slice %47 {offsets = [0, 64], sizes = [8, 32], strides = [1, 1]} : vector<8x128xf32> to vector<8x32xf32>
    %61 = math.tanh %60 : vector<8x32xf32>
    %62 = vector.extract_strided_slice %47 {offsets = [0, 96], sizes = [8, 32], strides = [1, 1]} : vector<8x128xf32> to vector<8x32xf32>
    %63 = arith.negf %62 : vector<8x32xf32>
    %64 = math.exp %63 : vector<8x32xf32>
    %cst_25 = arith.constant 1.000000e+00 : f32
    %65 = vector.broadcast %cst_25 : f32 to vector<8x32xf32>
    %66 = arith.addf %65, %64 : vector<8x32xf32>
    %67 = arith.divf %65, %66 : vector<8x32xf32>
    %c0_26 = arith.constant 0 : index
    %c0_27 = arith.constant 0 : index
    %68 = vector.load %arg5[%c0_26, %c0_27] : memref<8x32xf32, #tpu.memory_space<vmem>>, vector<8x32xf32>
    %69 = arith.mulf %59, %68 : vector<8x32xf32>
    %70 = arith.mulf %53, %61 : vector<8x32xf32>
    %71 = arith.addf %69, %70 : vector<8x32xf32>
    %72 = math.tanh %71 : vector<8x32xf32>
    %73 = arith.mulf %67, %72 : vector<8x32xf32>
    %c0_28 = arith.constant 0 : index
    %c0_29 = arith.constant 0 : index
    %74 = vector.load %arg5[%c0_28, %c0_29] : memref<8x32xf32, #tpu.memory_space<vmem>>, vector<8x32xf32>
    tpu.vector_store %arg5[%c0_28, %c0_29], %71 {strides = array<i32>} : memref<8x32xf32, #tpu.memory_space<vmem>>, vector<8x32xf32>,
    %c0_30 = arith.constant 0 : index
    %c0_31 = arith.constant 0 : index
    %75 = vector.load %arg4[%c0_30, %c0_31] : memref<8x32xf32, #tpu.memory_space<vmem>>, vector<8x32xf32>
    tpu.vector_store %arg4[%c0_30, %c0_31], %73 {strides = array<i32>} : memref<8x32xf32, #tpu.memory_space<vmem>>, vector<8x32xf32>,
    %76 = arith.index_cast %c1_i32 : i32 to index
    %c0_32 = arith.constant 0 : index
    %c0_33 = arith.constant 0 : index
    %77 = vector.load %arg3[%76, %c0_32, %c0_33] : memref<4x8x32xf32, #tpu.memory_space<vmem>>, vector<1x8x32xf32>
    %78 = vector.shape_cast %77 : vector<1x8x32xf32> to vector<8x32xf32>
    %79 = vector.shape_cast %73 : vector<8x32xf32> to vector<1x8x32xf32>
    tpu.vector_store %arg3[%76, %c0_32, %c0_33], %79 {strides = array<i32>} : memref<4x8x32xf32, #tpu.memory_space<vmem>>, vector<1x8x32xf32>,
    %c2_i32 = arith.constant 2 : i32
    %c0_34 = arith.constant 0 : index
    %c0_35 = arith.constant 0 : index
    %80 = vector.load %arg4[%c0_34, %c0_35] : memref<8x32xf32, #tpu.memory_space<vmem>>, vector<8x32xf32>
    %81 = arith.index_cast %c2_i32 : i32 to index
    %c0_36 = arith.constant 0 : index
    %c0_37 = arith.constant 0 : index
    %82 = vector.load %arg1[%81, %c0_36, %c0_37] : memref<4x8x128xf32, #tpu.memory_space<vmem>>, vector<1x8x128xf32>
    %83 = vector.shape_cast %82 : vector<1x8x128xf32> to vector<8x128xf32>
    %cst_38 = arith.constant dense<0.000000e+00> : vector<8x128xf32>
    %84 = tpu.matmul %80, %3, %cst_38 {dimension_numbers = #tpu.dot_dimension_numbers<[1], [0], [0], [1], [0, 0, 1, 1], [], []>} : vector<8x32xf32>, vector<32x128xf32>, vector<8x128xf32> -> vector<8x128xf32>
    %85 = arith.addf %83, %84 : vector<8x128xf32>
    %86 = vector.extract_strided_slice %85 {offsets = [0, 0], sizes = [8, 32], strides = [1, 1]} : vector<8x128xf32> to vector<8x32xf32>
    %87 = arith.negf %86 : vector<8x32xf32>
    %88 = math.exp %87 : vector<8x32xf32>
    %cst_39 = arith.constant 1.000000e+00 : f32
    %89 = vector.broadcast %cst_39 : f32 to vector<8x32xf32>
    %90 = arith.addf %89, %88 : vector<8x32xf32>
    %91 = arith.divf %89, %90 : vector<8x32xf32>
    %92 = vector.extract_strided_slice %85 {offsets = [0, 32], sizes = [8, 32], strides = [1, 1]} : vector<8x128xf32> to vector<8x32xf32>
    %93 = arith.negf %92 : vector<8x32xf32>
    %94 = math.exp %93 : vector<8x32xf32>
    %cst_40 = arith.constant 1.000000e+00 : f32
    %95 = vector.broadcast %cst_40 : f32 to vector<8x32xf32>
    %96 = arith.addf %95, %94 : vector<8x32xf32>
    %97 = arith.divf %95, %96 : vector<8x32xf32>
    %98 = vector.extract_strided_slice %85 {offsets = [0, 64], sizes = [8, 32], strides = [1, 1]} : vector<8x128xf32> to vector<8x32xf32>
    %99 = math.tanh %98 : vector<8x32xf32>
    %100 = vector.extract_strided_slice %85 {offsets = [0, 96], sizes = [8, 32], strides = [1, 1]} : vector<8x128xf32> to vector<8x32xf32>
    %101 = arith.negf %100 : vector<8x32xf32>
    %102 = math.exp %101 : vector<8x32xf32>
    %cst_41 = arith.constant 1.000000e+00 : f32
    %103 = vector.broadcast %cst_41 : f32 to vector<8x32xf32>
    %104 = arith.addf %103, %102 : vector<8x32xf32>
    %105 = arith.divf %103, %104 : vector<8x32xf32>
    %c0_42 = arith.constant 0 : index
    %c0_43 = arith.constant 0 : index
    %106 = vector.load %arg5[%c0_42, %c0_43] : memref<8x32xf32, #tpu.memory_space<vmem>>, vector<8x32xf32>
    %107 = arith.mulf %97, %106 : vector<8x32xf32>
    %108 = arith.mulf %91, %99 : vector<8x32xf32>
    %109 = arith.addf %107, %108 : vector<8x32xf32>
    %110 = math.tanh %109 : vector<8x32xf32>
    %111 = arith.mulf %105, %110 : vector<8x32xf32>
    %c0_44 = arith.constant 0 : index
    %c0_45 = arith.constant 0 : index
    %112 = vector.load %arg5[%c0_44, %c0_45] : memref<8x32xf32, #tpu.memory_space<vmem>>, vector<8x32xf32>
    tpu.vector_store %arg5[%c0_44, %c0_45], %109 {strides = array<i32>} : memref<8x32xf32, #tpu.memory_space<vmem>>, vector<8x32xf32>,
    %c0_46 = arith.constant 0 : index
    %c0_47 = arith.constant 0 : index
    %113 = vector.load %arg4[%c0_46, %c0_47] : memref<8x32xf32, #tpu.memory_space<vmem>>, vector<8x32xf32>
    tpu.vector_store %arg4[%c0_46, %c0_47], %111 {strides = array<i32>} : memref<8x32xf32, #tpu.memory_space<vmem>>, vector<8x32xf32>,
    %114 = arith.index_cast %c2_i32 : i32 to index
    %c0_48 = arith.constant 0 : index
    %c0_49 = arith.constant 0 : index
    %115 = vector.load %arg3[%114, %c0_48, %c0_49] : memref<4x8x32xf32, #tpu.memory_space<vmem>>, vector<1x8x32xf32>
    %116 = vector.shape_cast %115 : vector<1x8x32xf32> to vector<8x32xf32>
    %117 = vector.shape_cast %111 : vector<8x32xf32> to vector<1x8x32xf32>
    tpu.vector_store %arg3[%114, %c0_48, %c0_49], %117 {strides = array<i32>} : memref<4x8x32xf32, #tpu.memory_space<vmem>>, vector<1x8x32xf32>,
    %c3_i32 = arith.constant 3 : i32
    %c0_50 = arith.constant 0 : index
    %c0_51 = arith.constant 0 : index
    %118 = vector.load %arg4[%c0_50, %c0_51] : memref<8x32xf32, #tpu.memory_space<vmem>>, vector<8x32xf32>
    %119 = arith.index_cast %c3_i32 : i32 to index
    %c0_52 = arith.constant 0 : index
    %c0_53 = arith.constant 0 : index
    %120 = vector.load %arg1[%119, %c0_52, %c0_53] : memref<4x8x128xf32, #tpu.memory_space<vmem>>, vector<1x8x128xf32>
    %121 = vector.shape_cast %120 : vector<1x8x128xf32> to vector<8x128xf32>
    %cst_54 = arith.constant dense<0.000000e+00> : vector<8x128xf32>
    %122 = tpu.matmul %118, %3, %cst_54 {dimension_numbers = #tpu.dot_dimension_numbers<[1], [0], [0], [1], [0, 0, 1, 1], [], []>} : vector<8x32xf32>, vector<32x128xf32>, vector<8x128xf32> -> vector<8x128xf32>
    %123 = arith.addf %121, %122 : vector<8x128xf32>
    %124 = vector.extract_strided_slice %123 {offsets = [0, 0], sizes = [8, 32], strides = [1, 1]} : vector<8x128xf32> to vector<8x32xf32>
    %125 = arith.negf %124 : vector<8x32xf32>
    %126 = math.exp %125 : vector<8x32xf32>
    %cst_55 = arith.constant 1.000000e+00 : f32
    %127 = vector.broadcast %cst_55 : f32 to vector<8x32xf32>
    %128 = arith.addf %127, %126 : vector<8x32xf32>
    %129 = arith.divf %127, %128 : vector<8x32xf32>
    %130 = vector.extract_strided_slice %123 {offsets = [0, 32], sizes = [8, 32], strides = [1, 1]} : vector<8x128xf32> to vector<8x32xf32>
    %131 = arith.negf %130 : vector<8x32xf32>
    %132 = math.exp %131 : vector<8x32xf32>
    %cst_56 = arith.constant 1.000000e+00 : f32
    %133 = vector.broadcast %cst_56 : f32 to vector<8x32xf32>
    %134 = arith.addf %133, %132 : vector<8x32xf32>
    %135 = arith.divf %133, %134 : vector<8x32xf32>
    %136 = vector.extract_strided_slice %123 {offsets = [0, 64], sizes = [8, 32], strides = [1, 1]} : vector<8x128xf32> to vector<8x32xf32>
    %137 = math.tanh %136 : vector<8x32xf32>
    %138 = vector.extract_strided_slice %123 {offsets = [0, 96], sizes = [8, 32], strides = [1, 1]} : vector<8x128xf32> to vector<8x32xf32>
    %139 = arith.negf %138 : vector<8x32xf32>
    %140 = math.exp %139 : vector<8x32xf32>
    %cst_57 = arith.constant 1.000000e+00 : f32
    %141 = vector.broadcast %cst_57 : f32 to vector<8x32xf32>
    %142 = arith.addf %141, %140 : vector<8x32xf32>
    %143 = arith.divf %141, %142 : vector<8x32xf32>
    %c0_58 = arith.constant 0 : index
    %c0_59 = arith.constant 0 : index
    %144 = vector.load %arg5[%c0_58, %c0_59] : memref<8x32xf32, #tpu.memory_space<vmem>>, vector<8x32xf32>
    %145 = arith.mulf %135, %144 : vector<8x32xf32>
    %146 = arith.mulf %129, %137 : vector<8x32xf32>
    %147 = arith.addf %145, %146 : vector<8x32xf32>
    %148 = math.tanh %147 : vector<8x32xf32>
    %149 = arith.mulf %143, %148 : vector<8x32xf32>
    %c0_60 = arith.constant 0 : index
    %c0_61 = arith.constant 0 : index
    %150 = vector.load %arg5[%c0_60, %c0_61] : memref<8x32xf32, #tpu.memory_space<vmem>>, vector<8x32xf32>
    tpu.vector_store %arg5[%c0_60, %c0_61], %147 {strides = array<i32>} : memref<8x32xf32, #tpu.memory_space<vmem>>, vector<8x32xf32>,
    %c0_62 = arith.constant 0 : index
    %c0_63 = arith.constant 0 : index
    %151 = vector.load %arg4[%c0_62, %c0_63] : memref<8x32xf32, #tpu.memory_space<vmem>>, vector<8x32xf32>
    tpu.vector_store %arg4[%c0_62, %c0_63], %149 {strides = array<i32>} : memref<8x32xf32, #tpu.memory_space<vmem>>, vector<8x32xf32>,
    %152 = arith.index_cast %c3_i32 : i32 to index
    %c0_64 = arith.constant 0 : index
    %c0_65 = arith.constant 0 : index
    %153 = vector.load %arg3[%152, %c0_64, %c0_65] : memref<4x8x32xf32, #tpu.memory_space<vmem>>, vector<1x8x32xf32>
    %154 = vector.shape_cast %153 : vector<1x8x32xf32> to vector<8x32xf32>
    %155 = vector.shape_cast %149 : vector<8x32xf32> to vector<1x8x32xf32>
    tpu.vector_store %arg3[%152, %c0_64, %c0_65], %155 {strides = array<i32>} : memref<4x8x32xf32, #tpu.memory_space<vmem>>, vector<1x8x32xf32>,
    %c4_i32 = arith.constant 4 : i32
    return
  }
  func.func @transform_0(%arg0: i32) -> (i32, i32, i32) {
    %c0_i32 = arith.constant 0 : i32
    %c0_i32_0 = arith.constant 0 : i32
    %c0_i32_1 = arith.constant 0 : i32
    return %arg0, %c0_i32, %c0_i32_0 : i32, i32, i32
  }
  func.func @transform_1(%arg0: i32) -> (i32, i32) {
    %c0_i32 = arith.constant 0 : i32
    %c0_i32_0 = arith.constant 0 : i32
    %c0_i32_1 = arith.constant 0 : i32
    return %c0_i32, %c0_i32_0 : i32, i32
  }
  func.func @transform_2(%arg0: i32) -> (i32, i32, i32) {
    %c0_i32 = arith.constant 0 : i32
    %c0_i32_0 = arith.constant 0 : i32
    %c0_i32_1 = arith.constant 0 : i32
    return %arg0, %c0_i32, %c0_i32_0 : i32, i32, i32
  }
}

</mosaic_0001>

<bundles_post_ra>
// kernel: tpu_custom_call.1
= control target key start
LH: loop header
LB: loop body
LE: loop exit
PB: predicated region body
PF: predicated region fallthrough
CT: control target
= control target key end

     0   :  { %7 = vsyncpa [#allocation5], 0  ;;  %s1393_s0 = inlined_call_operand.hbm [shape: f32[8,8,128], index: 0, kind: input, shape index: {}]   ;;  %s1394_s1 = inlined_call_operand.hbm [shape: f32[32,128], index: 1, kind: input, shape index: {}]   ;;  %s1395_s2 = inlined_call_operand.hbm [shape: f32[8,8,32], index: 2, kind: output, shape index: {}]  }
   0x1   :  { %9 = vsyncpa [#allocation5 + $0x1], 0 }
   0x2   :  { %10 = vsyncpa [#allocation8], 0 }
   0x3   :  { %11 = vsyncpa [#allocation6], 0 }
   0x4   :  { %13 = vsyncpa [#allocation6 + $0x1], 0  ;;  %s1106_s9 = smov 0   ;;  %s1108_s10 = smov 0  }
   0x5   :  { %s1110_s11 = smov 0   ;;  %s1112_s12 = smov 0  }
   0x6 LB: > { %s1127_s13 = sadd.s32 4294967295, %s1076_s12   ;;  %s758_s14 = sadd.s32 4294967294, %s1076_s12   ;;  %s1076_s12 = sphi %s1112_s12, %s1418_s12   ;;  %s1072_s11 = sphi %s1110_s11, %s1417_s11   ;;  %s1068_s10 = sphi %s1108_s10, %s1416_s10   ;;  %s1064_s9 = sphi %s1106_s9, %s1415_s9  }
   0x7   : > { %p39_p0 = scmp.ne.s32.totalorder %s1068_s10, %s1064_s9  ;;  %p1396_p1 = scmp.eq.s32.totalorder %s1127_s13, 0 }
   0x8   : > { %p90_p3 = scmp.eq.s32.totalorder %s758_s14, 1  ;;  %p759_p5 = scmp.ge.s32.totalorder %s1076_s12, 1 }
   0x9   : > { %p1136_p4 = por %p1396_p1, %p39_p0  ;;  %p97_p7 = scmp.lt.s32.totalorder %s1076_s12, 3 }
   0xa   : > { %p1141_p6 = por %p90_p3, %p39_p0  ;;  %s1078_s18 = smov [#allocation7]  }
   0xb   : > { %s1400_s15 = scalar_select %p1136_p4, 1, 0 }
   0xc   : > { %s1401_s16 = scalar_select %p1141_p6, 1, 0 }
   0xd   : > { %p1147_p9 = pnand %p759_p5, %p97_p7  ;;  %s109_s19 = sshll.u32 %s1078_s18, 4  ;;  %s110_s19 = int_to_ptr.vmem [resolvable:$true] %s109_s19 }
   0xe   : > { %s1161_s21 = sadd.s32 1, %s1076_s12   ;;  %s26_s22 = sadd.s32 1, %s1072_s11 }
   0xf   : > { %s1402_s17 = scalar_select %p1147_p9, 1, 0 }
  0x10   : > { %p863_p10 = pneg %p1147_p9  ;;  %s23_s23 = ssub.s32 %s1076_s12, %s1161_s21 }
  0x11   : > { %s965_s24 = scalar_lea.vmem %s110_s19, 512  ;;  %p973_p7 = scmp.lt.s32.totalorder %s110_s19, %s110_s19 }
  0x12   : > { %p1156_p12 = pnand %p863_p10, %p1396_p1  ;;  %p966_p0 = scmp.ne.s32.totalorder %s110_s19, %s965_s24 }
  0x13   : > { %p974_p8 = scmp.lt.s32.totalorder %s965_s24, %s965_s24 }
  0x14   : > { %p956_p13 = pneg %p1156_p12 }
  0x15   : > { %p975_p11 = por %p974_p8, %p973_p7 }
  0x16   : > { %p968_p3 = pnand %p966_p0, %p956_p13 }
  0x18   : > { %p969_p5 = pneg %p968_p3 }
  0x1a   : > { %p976_p2 = pnand %p975_p11, %p969_p5 }
  0x1c   : > { %979 = shalt.err (!%p976_p2)
}
  0x1d   : > { %s1079_s25 = smov 128   ;;  %s1080_s26 = smov 8  }
  0x1e   : > { %866 = dma.hbm_to_vmem [thread:$0]  (!%p1156_p12), %s1394_s1, 512, %s110_s19, [#allocation8], %s1079_s25, %s1079_s25, %s1080_s26  }
  0x1f   : > { %p24_p2 = scmp.eq.s32.totalorder %s23_s23, 0  ;;  %p33_p8 = scmp.ne.s32.totalorder %s1072_s11, %s1068_s10 }
  0x20   : > { %p34_p10 = scmp.eq.s32.totalorder %s1076_s12, 0  ;;  %p876_p11 = scmp.lt.s32.totalorder %s1076_s12, 2 }
  0x21   : > { %s1181_s29 = scalar_select %p24_p2, %s1072_s11, %s26_s22  }
  0x22   : > { %p35_p13 = por %p34_p10, %p33_p8  ;;  %p1404_p0 = scmp.eq.s32.totalorder %s1127_s13, 1 }
  0x23   : > { %s123_s3 = sand.u32 1, %s1072_s11   ;;  %s789_s4 = sshll.u32 %s1076_s12, 9 }
  0x24   : > { %p1185_p3 = por %p1404_p0, %p33_p8  ;;  %s762_s5 = sshll.u32 %s123_s3, 5 }
  0x25   : > { %s1194_s8 = scalar_lea.hbm %s1393_s0, %s789_s4  ;;  %s127_s14 = scalar_lea.vmem [#allocation4], %s762_s5 }
  0x26   : > { %s1405_s30 = scalar_select %p1185_p3, 1, 0 }
  0x27   : > { %s134_s18 = sshll.u32 %s127_s14, 4  ;;  %p1196_p12 = pnand %p876_p11, %p35_p13  ;;  %s1200_s18 = int_to_ptr.vmem [resolvable:$true] %s134_s18 }
  0x28   : > { %s1202_s20 = scalar_lea.sflag [#allocation5], %s123_s3  ;;  %s980_s22 = scalar_lea.hbm %s1194_s8, 512 }
  0x29   : > { %p981_p5 = scmp.ne.s32.totalorder %s1194_s8, %s980_s22  ;;  %p982_p7 = pneg %p1196_p12 }
  0x2a   : > { %s985_s27 = scalar_lea.hbm %s1393_s0, 1024  ;;  %p986_p10 = scmp.lt.s32.totalorder %s1194_s8, %s1393_s0 }
  0x2b   : > { %p983_p2 = pnand %p982_p7, %p981_p5  ;;  %p987_p11 = scmp.lt.s32.totalorder %s985_s27, %s980_s22 }
  0x2d   : > { %p984_p8 = pneg %p983_p2  ;;  %p988_p13 = por %p987_p11, %p986_p10 }
  0x2f   : > { %p989_p0 = pnand %p988_p13, %p984_p8 }
  0x31   : > { %992 = shalt.err (!%p989_p0)
}
  0x32   : > { %s993_s3 = scalar_lea.vmem %s1200_s18, 512  ;;  %s1081_s5 = smov [#allocation4]  }
  0x33   : > { %p994_p1 = scmp.ne.s32.totalorder %s1200_s18, %s993_s3  ;;  %s998_s6 = sshll.u32 %s1081_s5, 4  ;;  %s999_s6 = int_to_ptr.vmem [resolvable:$false] %s998_s6 }
  0x34   : > { %s1000_s7 = scalar_lea.vmem %s999_s6, 1024  ;;  %p1001_p2 = scmp.lt.s32.totalorder %s1200_s18, %s999_s6 }
  0x35   : > { %p996_p6 = pnand %p994_p1, %p982_p7  ;;  %p1002_p3 = scmp.lt.s32.totalorder %s1000_s7, %s993_s3 }
  0x37   : > { %p997_p5 = pneg %p996_p6  ;;  %p1003_p4 = por %p1002_p3, %p1001_p2 }
  0x39   : > { %p1004_p9 = pnand %p1003_p4, %p997_p5 }
  0x3b   : > { %1007 = shalt.err (!%p1004_p9)
}
  0x3c   : > { %870 = dma.hbm_to_vmem [thread:$0]  (!%p1196_p12), %s1194_s8, 512, %s1200_s18, %s1202_s20, %s1079_s25, %s1079_s25, %s1080_s26  }
  0x3d   : > { %p1407_p1 = scmp.ne.s32.totalorder %s1402_s17, 0 }
  0x3e   : > { %s1229_s14 = sand.u32 (!%p1407_p1), 1, %s1068_s10   ;;  %p1408_p4 = scmp.ne.s32.totalorder (!%p1407_p1), %s1400_s15, 0 }
  0x3f   : > { %146 = sbr.rel (%p1407_p1) target bundleno = 2884 (0xb44), region = 28  ;;  %s766_s22 = sshll.u32 (!%p1407_p1), %s1229_s14, 5 }
  0x40   : > { %s149_s23 = scalar_lea.sflag (!%p1407_p1), [#allocation5], %s1229_s14  ;;  %s1233_s24 = scalar_lea.vmem (!%p1407_p1), [#allocation4], %s766_s22 }
  0x44   : > { %1051 = dma.done.wait (%p1408_p4), %s149_s23, 512  }
  0x45   : > { %1053 = vsyncadd (%p1408_p4), %s149_s23, 4294966784  ;;  %p1409_p6 = scmp.eq.s32.totalorder %s1127_s13, 0 }
  0x47   : > { %1055 = dma.done.wait (%p1409_p6), [#allocation8], 512   ;;  %p1410_p9 = pmov %p1409_p6 }
  0x48   : > { %s1243_s17 = scalar_lea.vmem [#allocation9], %s766_s22  ;;  %p1411_p3 = scmp.ne.s32.totalorder %s1127_s13, 0 }
  0x49   : > { %1057 = vsyncadd (%p1410_p9), [#allocation8], 4294966784 }
  0x4a   : > { %182 = sbr.rel (%p1411_p3) target bundleno = 81 (0x51), region = 40 }
  0x4f   : > { %vm183_vm0 = vcmask 261120   ;;  %v1082_v0 = vmov 0.0  }
  0x50   : > { %184 = vst.msk [vmem:[#allocation2] sm:$0xff] %vm183_vm0, %v1082_v0  ;;  %185 = vst.msk [vmem:[#allocation3] sm:$0xff] %vm183_vm0, %v1082_v0 }
  0x51 PF: > { %v1247_v1 = vld [vmem:[#allocation7 + $0x18] sm:$0xff]  ;;  %v1083_v2 = vmov 0.0   ;;  %v1250_v3 = vld [vmem:[#allocation7 + $0x10] sm:$0xff]  ;;  %vm1084_vm1 = vmmov 0   ;;  %v1257_v4 = vld [vmem:[#allocation7 + $0x8] sm:$0xff]  ;;  %vm192_vm2 = vcmask 261120  }
  0x52   : > { %811 = vmatprep.subr.mxu0 %v1083_v2  ;;  %819 = vmatprep.mubr.msk.f32.mxu0 %vm1084_vm1, %v1083_v2  ;;  %v1263_v5 = vld [vmem:[#allocation7] sm:$0xff]  ;;  %s1085_s15 = smov 64   ;;  %s1086_s25 = smov 32   ;;  %v772_v30 = vld [vmem:[%s1233_s24 + $0x8] sm:$0xff]  ;;  %v776_v52 = vld [vmem:[%s1233_s24 + $0x10] sm:$0xff] }
  0x53   : > { %812 = vmatpush3.msra.mxu0 %v1247_v1  ;;  %822 = vmatprep.subr.mxu1 %v1083_v2  ;;  %v191_v7 = vld [vmem:[%s1233_s24] sm:$0xff]  ;;  %s1087_s26 = smov 96   ;;  %s790_s8 = sshll.u32 %s1127_s13, 9 }
  0x54   : > { %813 = vmatprep.subr.mxu0 %v1083_v2  ;;  %823 = vmatpush3.msra.mxu1 %v1247_v1  ;;  %s675_s18 = sshll.u32 %s1243_s17, 4  ;;  %s1345_s27 = scalar_lea.hbm %s1395_s2, %s790_s8  ;;  %s1347_s18 = int_to_ptr.vmem [resolvable:$true] %s675_s18 }
  0x55   : > { %814 = vmatpush3.msra.mxu0 %v1250_v3  ;;  %824 = vmatprep.subr.mxu1 %v1083_v2  ;;  %s662_s28 = scalar_lea.sflag [#allocation6], %s1229_s14  ;;  %s1008_s4 = scalar_lea.vmem %s1347_s18, 512 }
  0x56   : > { %815 = vmatprep.subr.mxu0 %v1083_v2  ;;  %825 = vmatpush3.msra.mxu1 %v1250_v3  ;;  %p1009_p12 = scmp.ne.s32.totalorder %s1347_s18, %s1008_s4  ;;  %p1412_p7 = scmp.ne.s32.totalorder %s1405_s30, 0 }
  0x57   : > { %816 = vmatpush3.msra.mxu0 %v1257_v4  ;;  %v190_v6 = vld [vmem:[#allocation2] sm:$0xff]  ;;  %826 = vmatprep.subr.mxu1 %v1083_v2  ;;  %v274_v12 = vld [vmem:[#allocation3] sm:$0xff]  ;;  %s1088_s13 = smov [#allocation9]  }
  0x58   : > { %817 = vmatprep.subr.mxu0 %v1083_v2  ;;  %827 = vmatpush3.msra.mxu1 %v1257_v4  ;;  %p1010_p8 = pnand %p1009_p12, %p1412_p7  ;;  %s1012_s3 = sshll.u32 %s1088_s13, 4  ;;  %s1013_s3 = int_to_ptr.vmem [resolvable:$false] %s1012_s3 }
  0x59   : > { %818 = vmatpush3.msra.mxu0 %v1263_v5  ;;  %828 = vmatprep.subr.mxu1 %v1083_v2  ;;  %s1014_s5 = scalar_lea.vmem %s1013_s3, 1024  ;;  %p1015_p11 = scmp.lt.s32.totalorder %s1347_s18, %s1013_s3 }
  0x5a   : > { %820 = vmatmul.mubr.msk.f32.vlgmr.msra.gmra.mxu0 %vm192_vm2, %v190_v6  ;;  %829 = vmatpush3.msra.mxu1 %v1263_v5  ;;  %p1011_p10 = pneg %p1010_p8  ;;  %p1016_p13 = scmp.lt.s32.totalorder %s1014_s5, %s1008_s4 }
  0x5b   : > { %830 = vmatprep.mubr.msk.f32.mxu1 %vm1084_vm1, %v1083_v2  ;;  %833 = vmatprep.subr.mxu0 %v1083_v2 }
  0x5c   : > { %834 = vmatpush3.msra.mxu0 %v1247_v1  ;;  %841 = vmatprep.mubr.msk.f32.mxu0 %vm1084_vm1, %v1083_v2  ;;  %p1017_p0 = por %p1016_p13, %p1015_p11 }
  0x5d   : > { %835 = vmatprep.subr.mxu0 %v1083_v2  ;;  %844 = vmatprep.subr.mxu1 %v1083_v2 }
  0x5e   : > { %836 = vmatpush3.msra.mxu0 %v1250_v3  ;;  %p1018_p5 = pnand %p1017_p0, %p1011_p10 }
  0x5f   : > { %837 = vmatprep.subr.mxu0 %v1083_v2 }
  0x60   : > { %838 = vmatpush3.msra.mxu0 %v1257_v4 }
  0x61   : > { %839 = vmatprep.subr.mxu0 %v1083_v2 }
  0x62   : > { %840 = vmatpush3.msra.mxu0 %v1263_v5 }
 0x11a   : > { %v262_v8 = vpop.f32.mrf.mxu0 }
 0x11b   : > { %v266_v9 = vadd.f32 %v262_v8, %v191_v7 }
 0x11c   : > { %v821_v10 = vpop.f32.mrf.mxu0 }
 0x11d   : > { %922 = vtanh.f32 %v266_v9  ;;  %v771_v13 = vmul.f32 -1.442695, %v266_v9  ;;  %v780_v10 = vld [vmem:[%s1233_s24 + $0x18] sm:$0xff] }
 0x11f   : > { %924 = vpow2.f32 %v771_v13 }
 0x12a   : > { %v923_v11 = vpop.eup %922 }
 0x12b   : > { %281 = vrot.lane.b32.xlu0 %v923_v11, %s1085_s15 }
 0x12c   : > { %v925_v14 = vpop.eup %924 }
 0x12d   : > { %v270_v15 = vadd.f32 1.0, %v925_v14 }
 0x12f   : > { %276 = vrot.lane.b32.xlu0 %v274_v12, %s1086_s25  ;;  %926 = vrcp.f32 %v270_v15 }
 0x13c   : > { %v927_v16 = vpop.eup %926 }
 0x19d   : > { %v282_v17 = vpop.permute.xlu0 %281 }
 0x19e   : > { %v284_v18 = vmul.f32 %v927_v16, %v282_v17 }
 0x1a0   : > { %286 = vrot.lane.b32.xlu1 %v284_v18, %s1086_s25 }
 0x1a1   : > { %v277_v19 = vpop.permute.xlu0 %276 }
 0x1a2   : > { %v279_v20 = vmul.f32 %v927_v16, %v277_v19 }
 0x212   : > { %v287_v21 = vpop.permute.xlu1 %286 }
 0x213   : > { %v289_v22 = vadd.f32 %v287_v21, %v279_v20 }
 0x215   : > { %928 = vtanh.f32 %v289_v22 }
 0x222   : > { %v929_v23 = vpop.eup %928 }
 0x223   : > { %292 = vrot.lane.b32.xlu1 %v929_v23, %s1085_s15 }
 0x227   : > { %297 = vrot.lane.b32.xlu1 %v289_v22, %s1087_s26 }
 0x295   : > { %v293_v24 = vpop.permute.xlu1 %292 }
 0x296   : > { %v295_v25 = vmul.f32 %v927_v16, %v293_v24 }
 0x298   : > { %302 = vrot.lane.b32.xlu0 %v295_v25, %s1086_s25 }
 0x299   : > { %v298_v26 = vpop.permute.xlu1 %297 }
 0x29a   : > { %300 = vst.msk [vmem:[#allocation3] sm:$0xff] %vm192_vm2, %v298_v26 }
 0x2a1   : > { %v391_v27 = vld [vmem:[#allocation3] sm:$0xff] }
 0x2a2   : > { %393 = vrot.lane.b32.xlu1 %v391_v27, %s1086_s25 }
 0x30a   : > { %v303_v28 = vpop.permute.xlu0 %302 }
 0x30b   : > { %305 = vst.msk [vmem:[#allocation2] sm:$0xff] %vm192_vm2, %v303_v28  ;;  %306 = vst.msk [vmem:[%s1243_s17] sm:$0xff] %vm192_vm2, %v303_v28 }
 0x312   : > { %v307_v29 = vld [vmem:[#allocation2] sm:$0xff] }
 0x313   : > { %831 = vmatmul.mubr.msk.f32.vlgmr.msra.gmra.mxu1 %vm192_vm2, %v307_v29 }
 0x314   : > { %845 = vmatpush3.msra.mxu1 %v1247_v1  ;;  %852 = vmatprep.mubr.msk.f32.mxu1 %vm1084_vm1, %v1083_v2  ;;  %v394_v41 = vpop.permute.xlu1 %393 }
 0x315   : > { %846 = vmatprep.subr.mxu1 %v1083_v2 }
 0x316   : > { %847 = vmatpush3.msra.mxu1 %v1250_v3 }
 0x317   : > { %848 = vmatprep.subr.mxu1 %v1083_v2 }
 0x318   : > { %849 = vmatpush3.msra.mxu1 %v1257_v4 }
 0x319   : > { %850 = vmatprep.subr.mxu1 %v1083_v2 }
 0x31a   : > { %851 = vmatpush3.msra.mxu1 %v1263_v5 }
 0x3d3   : > { %v379_v31 = vpop.f32.mrf.mxu1 }
 0x3d4   : > { %v383_v32 = vadd.f32 %v772_v30, %v379_v31 }
 0x3d5   : > { %v832_v33 = vpop.f32.mrf.mxu1 }
 0x3d6   : > { %930 = vtanh.f32 %v383_v32  ;;  %v774_v35 = vmul.f32 -1.442695, %v383_v32 }
 0x3d8   : > { %932 = vpow2.f32 %v774_v35 }
 0x3e3   : > { %v931_v34 = vpop.eup %930 }
 0x3e4   : > { %398 = vrot.lane.b32.xlu0 %v931_v34, %s1085_s15 }
 0x3e5   : > { %v933_v36 = vpop.eup %932 }
 0x3e6   : > { %v387_v37 = vadd.f32 1.0, %v933_v36 }
 0x3e8   : > { %934 = vrcp.f32 %v387_v37 }
 0x3f5   : > { %v935_v38 = vpop.eup %934 }
 0x3f6   : > { %v396_v42 = vmul.f32 %v935_v38, %v394_v41 }
 0x456   : > { %v399_v39 = vpop.permute.xlu0 %398 }
 0x457   : > { %v401_v40 = vmul.f32 %v935_v38, %v399_v39 }
 0x459   : > { %403 = vrot.lane.b32.xlu0 %v401_v40, %s1086_s25 }
 0x4cb   : > { %v404_v43 = vpop.permute.xlu0 %403 }
 0x4cc   : > { %v406_v44 = vadd.f32 %v404_v43, %v396_v42 }
 0x4ce   : > { %936 = vtanh.f32 %v406_v44 }
 0x4db   : > { %v937_v45 = vpop.eup %936 }
 0x4dc   : > { %409 = vrot.lane.b32.xlu1 %v937_v45, %s1085_s15 }
 0x4e0   : > { %414 = vrot.lane.b32.xlu1 %v406_v44, %s1087_s26 }
 0x54e   : > { %v410_v46 = vpop.permute.xlu1 %409 }
 0x54f   : > { %v412_v47 = vmul.f32 %v935_v38, %v410_v46 }
 0x551   : > { %419 = vrot.lane.b32.xlu0 %v412_v47, %s1086_s25 }
 0x552   : > { %v415_v48 = vpop.permute.xlu1 %414 }
 0x553   : > { %417 = vst.msk [vmem:[#allocation3] sm:$0xff] %vm192_vm2, %v415_v48 }
 0x55a   : > { %v509_v49 = vld [vmem:[#allocation3] sm:$0xff] }
 0x55b   : > { %511 = vrot.lane.b32.xlu1 %v509_v49, %s1086_s25 }
 0x5c3   : > { %v420_v50 = vpop.permute.xlu0 %419 }
 0x5c4   : > { %422 = vst.msk [vmem:[#allocation2] sm:$0xff] %vm192_vm2, %v420_v50  ;;  %775 = vst.msk [vmem:[%s1243_s17 + $0x8] sm:$0xff] %vm192_vm2, %v420_v50 }
 0x5cb   : > { %v425_v51 = vld [vmem:[#allocation2] sm:$0xff] }
 0x5cc   : > { %842 = vmatmul.mubr.msk.f32.vlgmr.msra.gmra.mxu0 %vm192_vm2, %v425_v51 }
 0x5cd   : > { %v512_v63 = vpop.permute.xlu1 %511 }
 0x68c   : > { %v497_v53 = vpop.f32.mrf.mxu0 }
 0x68d   : > { %v501_v54 = vadd.f32 %v776_v52, %v497_v53 }
 0x68e   : > { %v843_v55 = vpop.f32.mrf.mxu0 }
 0x68f   : > { %938 = vtanh.f32 %v501_v54  ;;  %v778_v57 = vmul.f32 -1.442695, %v501_v54 }
 0x691   : > { %940 = vpow2.f32 %v778_v57 }
 0x69c   : > { %v939_v56 = vpop.eup %938 }
 0x69d   : > { %516 = vrot.lane.b32.xlu0 %v939_v56, %s1085_s15 }
 0x69e   : > { %v941_v58 = vpop.eup %940 }
 0x69f   : > { %v505_v59 = vadd.f32 1.0, %v941_v58 }
 0x6a1   : > { %942 = vrcp.f32 %v505_v59 }
 0x6ae   : > { %v943_v60 = vpop.eup %942 }
 0x6af   : > { %v514_v0 = vmul.f32 %v943_v60, %v512_v63 }
 0x70f   : > { %v517_v61 = vpop.permute.xlu0 %516 }
 0x710   : > { %v519_v62 = vmul.f32 %v943_v60, %v517_v61 }
 0x712   : > { %521 = vrot.lane.b32.xlu0 %v519_v62, %s1086_s25 }
 0x784   : > { %v522_v1 = vpop.permute.xlu0 %521 }
 0x785   : > { %v524_v2 = vadd.f32 %v522_v1, %v514_v0 }
 0x787   : > { %944 = vtanh.f32 %v524_v2 }
 0x794   : > { %v945_v3 = vpop.eup %944 }
 0x795   : > { %527 = vrot.lane.b32.xlu1 %v945_v3, %s1085_s15 }
 0x799   : > { %532 = vrot.lane.b32.xlu1 %v524_v2, %s1087_s26 }
 0x807   : > { %v528_v4 = vpop.permute.xlu1 %527 }
 0x808   : > { %v530_v5 = vmul.f32 %v943_v60, %v528_v4 }
 0x80a   : > { %537 = vrot.lane.b32.xlu0 %v530_v5, %s1086_s25 }
 0x80b   : > { %v533_v6 = vpop.permute.xlu1 %532 }
 0x80c   : > { %535 = vst.msk [vmem:[#allocation3] sm:$0xff] %vm192_vm2, %v533_v6 }
 0x813   : > { %v627_v7 = vld [vmem:[#allocation3] sm:$0xff] }
 0x814   : > { %629 = vrot.lane.b32.xlu1 %v627_v7, %s1086_s25 }
 0x87c   : > { %v538_v8 = vpop.permute.xlu0 %537 }
 0x87d   : > { %540 = vst.msk [vmem:[#allocation2] sm:$0xff] %vm192_vm2, %v538_v8  ;;  %779 = vst.msk [vmem:[%s1243_s17 + $0x10] sm:$0xff] %vm192_vm2, %v538_v8 }
 0x884   : > { %v543_v9 = vld [vmem:[#allocation2] sm:$0xff] }
 0x885   : > { %853 = vmatmul.mubr.msk.f32.vlgmr.msra.gmra.mxu1 %vm192_vm2, %v543_v9 }
 0x886   : > { %v630_v21 = vpop.permute.xlu1 %629 }
 0x945   : > { %v615_v11 = vpop.f32.mrf.mxu1 }
 0x946   : > { %v619_v12 = vadd.f32 %v780_v10, %v615_v11 }
 0x947   : > { %v854_v13 = vpop.f32.mrf.mxu1 }
 0x948   : > { %946 = vtanh.f32 %v619_v12  ;;  %v782_v15 = vmul.f32 -1.442695, %v619_v12 }
 0x94a   : > { %948 = vpow2.f32 %v782_v15 }
 0x955   : > { %v947_v14 = vpop.eup %946 }
 0x956   : > { %634 = vrot.lane.b32.xlu0 %v947_v14, %s1085_s15 }
 0x957   : > { %v949_v16 = vpop.eup %948 }
 0x958   : > { %v623_v17 = vadd.f32 1.0, %v949_v16 }
 0x95a   : > { %950 = vrcp.f32 %v623_v17 }
 0x967   : > { %v951_v18 = vpop.eup %950 }
 0x968   : > { %v632_v22 = vmul.f32 %v951_v18, %v630_v21 }
 0x9c8   : > { %v635_v19 = vpop.permute.xlu0 %634 }
 0x9c9   : > { %v637_v20 = vmul.f32 %v951_v18, %v635_v19 }
 0x9cb   : > { %639 = vrot.lane.b32.xlu0 %v637_v20, %s1086_s25 }
 0xa3d   : > { %v640_v23 = vpop.permute.xlu0 %639 }
 0xa3e   : > { %v642_v24 = vadd.f32 %v640_v23, %v632_v22 }
 0xa40   : > { %952 = vtanh.f32 %v642_v24 }
 0xa4d   : > { %v953_v25 = vpop.eup %952 }
 0xa4e   : > { %645 = vrot.lane.b32.xlu1 %v953_v25, %s1085_s15 }
 0xa52   : > { %650 = vrot.lane.b32.xlu1 %v642_v24, %s1087_s26 }
 0xac0   : > { %v646_v26 = vpop.permute.xlu1 %645 }
 0xac1   : > { %v648_v27 = vmul.f32 %v951_v18, %v646_v26 }
 0xac3   : > { %655 = vrot.lane.b32.xlu0 %v648_v27, %s1086_s25 }
 0xac4   : > { %v651_v28 = vpop.permute.xlu1 %650 }
 0xac5   : > { %653 = vst.msk [vmem:[#allocation3] sm:$0xff] %vm192_vm2, %v651_v28 }
 0xb35   : > { %v656_v29 = vpop.permute.xlu0 %655 }
 0xb36   : > { %658 = vst.msk [vmem:[#allocation2] sm:$0xff] %vm192_vm2, %v656_v29  ;;  %783 = vst.msk [vmem:[%s1243_s17 + $0x18] sm:$0xff] %vm192_vm2, %v656_v29 }
 0xb37   : > { %1021 = shalt.err (!%p1018_p5)
}
 0xb38   : > { %s1022_s6 = scalar_lea.hbm %s1345_s27, 512  ;;  %s1026_s23 = scalar_lea.hbm %s1395_s2, 1024 }
 0xb39   : > { %p1023_p2 = scmp.ne.s32.totalorder %s1345_s27, %s1022_s6  ;;  %p1027_p6 = scmp.lt.s32.totalorder %s1345_s27, %s1395_s2 }
 0xb3a   : > { %p1028_p9 = scmp.lt.s32.totalorder %s1026_s23, %s1022_s6 }
 0xb3b   : > { %p1024_p1 = pnand %p1023_p2, %p1412_p7 }
 0xb3c   : > { %p1029_p3 = por %p1028_p9, %p1027_p6 }
 0xb3d   : > { %p1025_p4 = pneg %p1024_p1 }
 0xb3f   : > { %p1030_p12 = pnand %p1029_p3, %p1025_p4 }
 0xb41   : > { %1033 = shalt.err (!%p1030_p12)
}
 0xb42   : > { %s1089_s15 = smov 128   ;;  %s1090_s25 = smov 8  }
 0xb43   : > { %861 = dma.vmem_to_hbm [thread:$0]  (%p1412_p7), %s1347_s18, 512, %s1345_s27, %s662_s28, %s1089_s15, %s1089_s15, %s1090_s25  }
 0xb44 PF: > { %s690_s26 = sand.u32 1, %s1064_s9   ;;  %p1413_p8 = scmp.ne.s32.totalorder %s1401_s16, 0 }
 0xb45   : > { %p1414_p10 = scmp.ge.s32.totalorder %s1076_s12, 2  ;;  %s691_s8 = scalar_lea.sflag [#allocation6], %s690_s26 }
 0xb47   : > { %p872_p11 = pnand %p1414_p10, %p1413_p8 }
 0xb49   : > { %p873_p13 = pneg %p872_p11 }
 0xb4b   : > { %1059 = dma.done.wait (%p873_p13), %s691_s8, 512  }
 0xb4c   : > { %1061 = vsyncadd (%p873_p13), %s691_s8, 4294966784  ;;  %p16_p0 = scmp.ge.s32.totalorder %s1161_s21, 4   ;;  %s1415_s9 = smov %s1068_s10 }
 0xb4d   : > { %s1416_s10 = smov %s1072_s11  ;;  %s1417_s11 = smov %s1181_s29 }
 0xb4e   : > { %s1418_s12 = smov %s1161_s21  ;;  %18 = sbr.rel (!%p16_p0) target bundleno = 6 (0x6), region = 87 }
 0xb53   :  { %696 = vsyncpa [#allocation5], 1 }
 0xb54   :  { %698 = vsyncpa [#allocation5 + $0x1], 1 }
 0xb55   :  { %699 = vsyncpa [#allocation8], 1 }
 0xb56   :  { %700 = vsyncpa [#allocation6], 1 }
 0xb57   :  { %702 = vsyncpa [#allocation6 + $0x1], 1 }

</bundles_post_ra>
